<compile_context>
chip_gen: v6e
topology: v6e:2x2x1
jax: 0.10.0
libtpu: 0.0.40
codegen_flags: <defaults>
</compile_context>

<pallas_src>
import jax
import jax.numpy as jnp
from jax.experimental import pallas as pl
from jax.experimental.pallas import tpu as pltpu


_LANE = 128      # lane width: last-dim tiling unit


def _round_up(x, m):
    return (x + m - 1) // m * m


def _netc_kernel(x_ref, w1_ref, b1_ref, w2_ref, b2_ref, o_ref):
    """Fused MLP tile: out = relu(x @ W1 + b1) @ W2 + b2 for one batch tile."""
    mm_dtype = w1_ref.dtype
    x = x_ref[...].astype(mm_dtype)                                   # in-vreg cast (free)
    h = jnp.dot(x, w1_ref[...], preferred_element_type=jnp.float32)  # MXU, f32 acc
    h = h + b1_ref[...]                                               # broadcast (1, D)
    h = jnp.maximum(h, 0.0)                                           # ReLU (VPU)
    h = h.astype(mm_dtype)                                            # bf16 path: bf16 MXU inputs
    o = jnp.dot(h, w2_ref[...], preferred_element_type=jnp.float32)  # MXU, f32 acc
    o = o + b2_ref[...]                                               # broadcast (1, Cpad)
    o_ref[...] = o.astype(o_ref.dtype)


def netc_forward(x, w1, b1, w2, b2, *, tile_b=None, use_bf16=False,
                 single_buffer_weights=None):
    """Pallas implementation of _netC.forward.

    x  : (N, 2*ndf) float32
    w1 : (2*ndf, 2*ndf)    b1 : (2*ndf,)
    w2 : (2*ndf, nclasses) b2 : (nclasses,)
    returns (N, nclasses); float32 by default, bfloat16 when use_bf16=True.
    """
    N, D = x.shape
    D2, C = w2.shape
    assert w1.shape == (D, D) and D2 == D and b1.shape == (D,) and b2.shape == (C,)

    mm_dtype = jnp.bfloat16 if use_bf16 else jnp.float32
    out_dtype = mm_dtype                       # bf16 writeback halves padded-C HBM traffic
    sub = 16 if use_bf16 else 8                # sublane pack of narrowest tiled dtype

    # ---- tile selection --------------------------------------------------------
    if tile_b is None:
        if N <= 1024:
            tile_b = _round_up(N, sub)                       # single grid step
        else:
            # >=2 steps so v7x megacore ("parallel") can shard across both TCs.
            tile_b = min(1024, _round_up(pl.cdiv(N, 2), sub))
    tile_b = max(sub, _round_up(tile_b, sub))
    grid_b = pl.cdiv(N, tile_b)                # ragged last block handled by Pallas

    C_pad = _round_up(C, _LANE)                # lane-dense output block (unmasked vst)

    # ---- weights/biases: cast once, pad C to lane width ------------------------
    w1_p = w1.astype(mm_dtype)
    w2_p = w2.astype(mm_dtype)
    b2_p = b2
    if C_pad != C:
        w2_p = jnp.pad(w2_p, ((0, 0), (0, C_pad - C)))
        b2_p = jnp.pad(b2_p, ((0, C_pad - C),))
    b1_2d = b1.reshape(1, D).astype(jnp.float32)
    b2_2d = b2_p.reshape(1, C_pad).astype(jnp.float32)

    # ---- VMEM budget & buffering of grid-invariant operands --------------------
    itm_w = jnp.dtype(mm_dtype).itemsize
    itm_o = jnp.dtype(out_dtype).itemsize
    w_bytes = (D * D + D * C_pad) * itm_w + (D + C_pad) * 4
    if single_buffer_weights is None:
        single_buffer_weights = w_bytes > (4 << 20)   # only matters when ndf scales
    w_buf = 1 if single_buffer_weights else 2
    w_mode = dict(pipeline_mode=pl.Buffered(1)) if single_buffer_weights else {}

    vmem_est = (2 * tile_b * D * 4              # x tile (f32 in HBM), double-buffered
                + 2 * tile_b * C_pad * itm_o    # out tile, double-buffered
                + w_buf * w_bytes)              # resident weights/biases

    try:
        vmem_cap = pltpu.get_tpu_info().vmem_capacity_bytes
    except Exception:
        vmem_cap = 64 << 20                     # v7x physical floor as safe fallback
    compiler_kwargs = dict(dimension_semantics=("parallel",))
    if vmem_est > (12 << 20):                   # conservative vs v5e's 16 MiB scoped default
        compiler_kwargs["vmem_limit_bytes"] = int(min(vmem_est * 2, 0.85 * vmem_cap))

    cost = pl.CostEstimate(
        flops=2 * N * D * (D + C_pad),
        transcendentals=0,
        bytes_accessed=N * D * 4 + w_bytes + N * C_pad * itm_o)

    out_p = pl.pallas_call(
        _netc_kernel,
        out_shape=jax.ShapeDtypeStruct((N, C_pad), out_dtype),
        grid_spec=pl.GridSpec(
            grid=(grid_b,),
            in_specs=[
                pl.BlockSpec((tile_b, D), lambda i: (i, 0)),            # x tile (f32)
                pl.BlockSpec((D, D),      lambda i: (0, 0), **w_mode),  # W1 (resident)
                pl.BlockSpec((1, D),      lambda i: (0, 0), **w_mode),  # b1
                pl.BlockSpec((D, C_pad),  lambda i: (0, 0), **w_mode),  # W2 (lane-padded)
                pl.BlockSpec((1, C_pad),  lambda i: (0, 0), **w_mode),  # b2
            ],
            out_specs=pl.BlockSpec((tile_b, C_pad), lambda i: (i, 0)),
        ),
        compiler_params=pltpu.CompilerParams(**compiler_kwargs),
        cost_estimate=cost,
    )(x, w1_p, b1_2d, w2_p, b2_2d)

    # NOTE: this slice is one extra (cheap) XLA pass over the output; keep the
    # padded (N, C_pad) result downstream if the consumer tolerates it.
    return out_p[:, :C]


def _reference(x, w1, b1, w2, b2):
    h = jnp.maximum(x @ w1 + b1, 0.0)
    return h @ w2 + b2


if __name__ == "__main__":
    # Shapes consistent with the module: opt.ndf = 64 -> 2*ndf = 128 features,
    # nclasses = 16, batch = 128.
    ndf = 64
    D = 2 * ndf
    nclasses = 16
    N = 128

    key = jax.random.PRNGKey(0)
    kx, k1, kb1, k2, kb2 = jax.random.split(key, 5)

    x  = jax.random.normal(kx,  (N, D), dtype=jnp.float32)
    # Deterministic synthetic parameters (Linear weights stored as (in, out)).
    w1 = jax.random.normal(k1,  (D, D), dtype=jnp.float32) * (1.0 / jnp.sqrt(D))
    b1 = jax.random.normal(kb1, (D,),   dtype=jnp.float32) * 0.01
    w2 = jax.random.normal(k2,  (D, nclasses), dtype=jnp.float32) * (1.0 / jnp.sqrt(D))
    b2 = jax.random.normal(kb2, (nclasses,),   dtype=jnp.float32) * 0.01

    # f32 path: single grid step, lane-dense (padded) output, no wrapper pad/cast.
    out = jax.block_until_ready(netc_forward(x, w1, b1, w2, b2))
    ref = _reference(x, w1, b1, w2, b2)
    assert out.shape == (N, nclasses)
    assert jnp.allclose(out, ref, atol=1e-4, rtol=1e-4), "mismatch vs reference (f32)"

    # Non-divisible batch with a multi-step grid: exercises the ragged last block.
    N2 = 100
    out2 = jax.block_until_ready(netc_forward(x[:N2], w1, b1, w2, b2, tile_b=64))
    ref2 = _reference(x[:N2], w1, b1, w2, b2)
    assert out2.shape == (N2, nclasses)
    assert jnp.allclose(out2, ref2, atol=1e-4, rtol=1e-4), "mismatch vs reference (ragged batch)"

    # bf16 weights/activations (f32 MXU accumulation, x cast in-kernel), looser tolerance.
    out_bf = jax.block_until_ready(netc_forward(x, w1, b1, w2, b2, use_bf16=True))
    assert out_bf.shape == (N, nclasses)
    assert jnp.allclose(out_bf.astype(jnp.float32), ref, atol=1e-1, rtol=1e-1), \
        "mismatch vs reference (bf16)"

    print("KERNEL_OK")
</pallas_src>

<mosaic_0001>
module attributes {stable_mosaic.version = 11 : i64} {
  func.func @_netc_kernel(%arg0: i32, %arg1: memref<128x128xf32, #tpu.memory_space<vmem>>, %arg2: memref<128x128xf32, #tpu.memory_space<vmem>>, %arg3: memref<1x128xf32, #tpu.memory_space<vmem>>, %arg4: memref<128x128xf32, #tpu.memory_space<vmem>>, %arg5: memref<1x128xf32, #tpu.memory_space<vmem>>, %arg6: memref<128x128xf32, #tpu.memory_space<vmem>>) attributes {dimension_semantics = [#tpu.dimension_semantics<parallel>], iteration_bounds = array<i64: 1>, scalar_prefetch = 0 : i64, scratch_operands = 0 : i64, tpu.core_type = #tpu.core_type<tc>, window_params = [{transform_indices = @transform_0, window_bounds = array<i64: 128, 128>}, {pipeline_mode = #tpu.pipeline_mode<synchronous>, transform_indices = @transform_1, window_bounds = array<i64: 128, 128>}, {pipeline_mode = #tpu.pipeline_mode<synchronous>, transform_indices = @transform_2, window_bounds = array<i64: 1, 128>}, {pipeline_mode = #tpu.pipeline_mode<synchronous>, transform_indices = @transform_3, window_bounds = array<i64: 128, 128>}, {pipeline_mode = #tpu.pipeline_mode<synchronous>, transform_indices = @transform_4, window_bounds = array<i64: 1, 128>}, {transform_indices = @transform_5, window_bounds = array<i64: 128, 128>}]} {
    %c0 = arith.constant 0 : index
    %c0_0 = arith.constant 0 : index
    %0 = vector.load %arg1[%c0, %c0_0] : memref<128x128xf32, #tpu.memory_space<vmem>>, vector<128x128xf32>
    %c0_1 = arith.constant 0 : index
    %c0_2 = arith.constant 0 : index
    %1 = vector.load %arg2[%c0_1, %c0_2] : memref<128x128xf32, #tpu.memory_space<vmem>>, vector<128x128xf32>
    %cst = arith.constant dense<0.000000e+00> : vector<128x128xf32>
    %2 = tpu.matmul %0, %1, %cst {dimension_numbers = #tpu.dot_dimension_numbers<[1], [0], [0], [1], [0, 0, 1, 1], [], []>} : vector<128x128xf32>, vector<128x128xf32>, vector<128x128xf32> -> vector<128x128xf32>
    %c0_3 = arith.constant 0 : index
    %c0_4 = arith.constant 0 : index
    %3 = vector.load %arg3[%c0_3, %c0_4] : memref<1x128xf32, #tpu.memory_space<vmem>>, vector<1x128xf32>
    %4 = vector.broadcast %3 : vector<1x128xf32> to vector<128x128xf32>
    %5 = arith.addf %2, %4 : vector<128x128xf32>
    %cst_5 = arith.constant 0.000000e+00 : f32
    %6 = vector.broadcast %cst_5 : f32 to vector<128x128xf32>
    %7 = arith.maximumf %5, %6 : vector<128x128xf32>
    %c0_6 = arith.constant 0 : index
    %c0_7 = arith.constant 0 : index
    %8 = vector.load %arg4[%c0_6, %c0_7] : memref<128x128xf32, #tpu.memory_space<vmem>>, vector<128x128xf32>
    %cst_8 = arith.constant dense<0.000000e+00> : vector<128x128xf32>
    %9 = tpu.matmul %7, %8, %cst_8 {dimension_numbers = #tpu.dot_dimension_numbers<[1], [0], [0], [1], [0, 0, 1, 1], [], []>} : vector<128x128xf32>, vector<128x128xf32>, vector<128x128xf32> -> vector<128x128xf32>
    %c0_9 = arith.constant 0 : index
    %c0_10 = arith.constant 0 : index
    %10 = vector.load %arg5[%c0_9, %c0_10] : memref<1x128xf32, #tpu.memory_space<vmem>>, vector<1x128xf32>
    %11 = vector.broadcast %10 : vector<1x128xf32> to vector<128x128xf32>
    %12 = arith.addf %9, %11 : vector<128x128xf32>
    %c0_11 = arith.constant 0 : index
    %c0_12 = arith.constant 0 : index
    %13 = vector.load %arg6[%c0_11, %c0_12] : memref<128x128xf32, #tpu.memory_space<vmem>>, vector<128x128xf32>
    tpu.vector_store %arg6[%c0_11, %c0_12], %12 {strides = array<i32>} : memref<128x128xf32, #tpu.memory_space<vmem>>, vector<128x128xf32>,
    return
  }
  func.func @transform_0(%arg0: i32) -> (i32, i32) {
    %c0_i32 = arith.constant 0 : i32
    %c0_i32_0 = arith.constant 0 : i32
    return %arg0, %c0_i32 : i32, i32
  }
  func.func @transform_1(%arg0: i32) -> (i32, i32) {
    %c0_i32 = arith.constant 0 : i32
    %c0_i32_0 = arith.constant 0 : i32
    %c0_i32_1 = arith.constant 0 : i32
    return %c0_i32, %c0_i32_0 : i32, i32
  }
  func.func @transform_2(%arg0: i32) -> (i32, i32) {
    %c0_i32 = arith.constant 0 : i32
    %c0_i32_0 = arith.constant 0 : i32
    %c0_i32_1 = arith.constant 0 : i32
    return %c0_i32, %c0_i32_0 : i32, i32
  }
  func.func @transform_3(%arg0: i32) -> (i32, i32) {
    %c0_i32 = arith.constant 0 : i32
    %c0_i32_0 = arith.constant 0 : i32
    %c0_i32_1 = arith.constant 0 : i32
    return %c0_i32, %c0_i32_0 : i32, i32
  }
  func.func @transform_4(%arg0: i32) -> (i32, i32) {
    %c0_i32 = arith.constant 0 : i32
    %c0_i32_0 = arith.constant 0 : i32
    %c0_i32_1 = arith.constant 0 : i32
    return %c0_i32, %c0_i32_0 : i32, i32
  }
  func.func @transform_5(%arg0: i32) -> (i32, i32) {
    %c0_i32 = arith.constant 0 : i32
    %c0_i32_0 = arith.constant 0 : i32
    return %arg0, %c0_i32 : i32, i32
  }
}

</mosaic_0001>

<bundles_post_ra>
// kernel: tpu_custom_call.1
= control target key start
LH: loop header
LB: loop body
LE: loop exit
PB: predicated region body
PF: predicated region fallthrough
CT: control target
= control target key end

     0   :  { %10 = vsyncpa [#allocation3], 0  ;;  %s800_s0 = inlined_call_operand.hbm [shape: f32[128,128], index: 0, kind: input, shape index: {}]   ;;  %s801_s1 = inlined_call_operand.hbm [shape: f32[128,128], index: 1, kind: input, shape index: {}]   ;;  %s802_s2 = inlined_call_operand.vmem [shape: f32[1,128], index: 2, kind: input, shape index: {}]   ;;  %s803_s3 = inlined_call_operand.hbm [shape: f32[128,128], index: 3, kind: input, shape index: {}]   ;;  %s804_s4 = inlined_call_operand.vmem [shape: f32[1,128], index: 4, kind: input, shape index: {}]   ;;  %s805_s5 = inlined_call_operand.hbm [shape: f32[128,128], index: 5, kind: output, shape index: {}]  }
   0x1   :  { %11 = vsyncpa [#allocation6], 0 }
   0x2   :  { %12 = vsyncpa [#allocation4], 0  ;;  %s734_s18 = smov [#allocation5]   ;;  %s735_s20 = smov [#allocation2]  }
   0x3   :  { %s30_s19 = sshll.u32 %s734_s18, 4  ;;  %s18_s21 = sshll.u32 %s735_s20, 4  ;;  %s31_s19 = int_to_ptr.vmem [resolvable:$true] %s30_s19  ;;  %s19_s21 = int_to_ptr.vmem [resolvable:$true] %s18_s21 }
   0x4   :  { %s656_s22 = scalar_lea.vmem %s31_s19, 2048  ;;  %p661_p1 = scmp.lt.s32.totalorder %s31_s19, %s31_s19 }
   0x5   :  { %p657_p0 = scmp.ne.s32.totalorder %s31_s19, %s656_s22  ;;  %p662_p2 = scmp.lt.s32.totalorder %s656_s22, %s656_s22 }
   0x7   :  { %p663_p3 = por %p662_p2, %p661_p1 }
   0x9   :  { %p664_p4 = pnand %p663_p3, %p657_p0 }
   0xb   :  { %667 = shalt.err (!%p664_p4)
}
   0xc   :  { %s736_s23 = smov 128   ;;  %s737_s24 = smov 8  }
   0xd   :  { %36 = dma.hbm_to_vmem [thread:$0]  %s801_s1, 2048, %s31_s19, [#allocation6], %s736_s23, %s736_s23, %s737_s24  }
   0xe   :  { %s676_s27 = scalar_lea.vmem %s19_s21, 2048  ;;  %p681_p6 = scmp.lt.s32.totalorder %s19_s21, %s19_s21 }
   0xf   :  { %p677_p5 = scmp.ne.s32.totalorder %s19_s21, %s676_s27  ;;  %p682_p7 = scmp.lt.s32.totalorder %s676_s27, %s676_s27 }
  0x11   :  { %p683_p8 = por %p682_p7, %p681_p6 }
  0x13   :  { %p684_p9 = pnand %p683_p8, %p677_p5 }
  0x15   :  { %687 = shalt.err (!%p684_p9)
}
  0x16   :  { %24 = dma.hbm_to_vmem [thread:$0]  %s800_s0, 2048, %s19_s21, [#allocation3], %s736_s23, %s736_s23, %s737_s24  }
  0x17   :  { %s738_s30 = smov [#allocation7]  }
  0x18   :  { %s44_s6 = sshll.u32 %s738_s30, 4  ;;  %s45_s6 = int_to_ptr.vmem [resolvable:$true] %s44_s6 }
  0x19   :  { %s696_s7 = scalar_lea.vmem %s45_s6, 2048  ;;  %p701_p11 = scmp.lt.s32.totalorder %s45_s6, %s45_s6 }
  0x1a   :  { %p697_p10 = scmp.ne.s32.totalorder %s45_s6, %s696_s7  ;;  %p702_p12 = scmp.lt.s32.totalorder %s696_s7, %s696_s7 }
  0x1c   :  { %p703_p13 = por %p702_p12, %p701_p11 }
  0x1e   :  { %p704_p0 = pnand %p703_p13, %p697_p10 }
  0x20   :  { %707 = shalt.err (!%p704_p0)
}
  0x21   :  { %50 = dma.hbm_to_vmem [thread:$0]  %s803_s3, 2048, %s45_s6, [#allocation6], %s736_s23, %s736_s23, %s737_s24  }
  0x22   :  { %728 = dma.done.wait [#allocation3], 2048  }
  0x23   :  { %729 = vsyncadd [#allocation3], 4294965248 }
  0x24   :  { %730 = dma.done.wait [#allocation6], 4096  }
  0x25   :  { %731 = vsyncadd [#allocation6], 4294963200  ;;  %v93_v0 = vld [vmem:[#allocation5 + $0x78] sm:$0xff]  ;;  %v92_v1 = vld [vmem:[#allocation5 + $0x70] sm:$0xff] }
  0x26   :  { %530 = vmatprep.subr.mxu0 %v93_v0  ;;  %v91_v2 = vld [vmem:[#allocation5 + $0x68] sm:$0xff]  ;;  %v90_v3 = vld [vmem:[#allocation5 + $0x60] sm:$0xff]  ;;  %v89_v5 = vld [vmem:[#allocation5 + $0x58] sm:$0xff] }
  0x27   :  { %531 = vmatpush3.msra.mxu0 %v93_v0  ;;  %v62_v4 = vld [vmem:[#allocation2] sm:$0xff]  ;;  %v88_v6 = vld [vmem:[#allocation5 + $0x50] sm:$0xff]  ;;  %v87_v7 = vld [vmem:[#allocation5 + $0x48] sm:$0xff] }
  0x28   :  { %532 = vmatprep.subr.mxu0 %v92_v1  ;;  %562 = vmatprep.mubr.f32.mxu0 %v62_v4  ;;  %v277_v8 = vld [vmem:[#allocation7 + $0x78] sm:$0xff]  ;;  %v276_v9 = vld [vmem:[#allocation7 + $0x70] sm:$0xff]  ;;  %v86_v10 = vld [vmem:[#allocation5 + $0x40] sm:$0xff] }
  0x29   :  { %533 = vmatpush3.msra.mxu0 %v92_v1  ;;  %586 = vmatprep.subr.mxu1 %v277_v8  ;;  %v275_v11 = vld [vmem:[#allocation7 + $0x68] sm:$0xff]  ;;  %v85_v12 = vld [vmem:[#allocation5 + $0x38] sm:$0xff]  ;;  %v274_v13 = vld [vmem:[#allocation7 + $0x60] sm:$0xff] }
  0x2a   :  { %534 = vmatprep.subr.mxu0 %v91_v2  ;;  %587 = vmatpush3.msra.mxu1 %v277_v8  ;;  %v84_v14 = vld [vmem:[#allocation5 + $0x30] sm:$0xff]  ;;  %v273_v15 = vld [vmem:[#allocation7 + $0x58] sm:$0xff]  ;;  %v83_v16 = vld [vmem:[#allocation5 + $0x28] sm:$0xff] }
  0x2b   :  { %535 = vmatpush3.msra.mxu0 %v91_v2  ;;  %588 = vmatprep.subr.mxu1 %v276_v9  ;;  %v272_v17 = vld [vmem:[#allocation7 + $0x50] sm:$0xff]  ;;  %v82_v18 = vld [vmem:[#allocation5 + $0x20] sm:$0xff]  ;;  %v271_v19 = vld [vmem:[#allocation7 + $0x48] sm:$0xff] }
  0x2c   :  { %536 = vmatprep.subr.mxu0 %v90_v3  ;;  %589 = vmatpush3.msra.mxu1 %v276_v9  ;;  %v81_v20 = vld [vmem:[#allocation5 + $0x18] sm:$0xff]  ;;  %v270_v21 = vld [vmem:[#allocation7 + $0x40] sm:$0xff]  ;;  %v80_v22 = vld [vmem:[#allocation5 + $0x10] sm:$0xff] }
  0x2d   :  { %537 = vmatpush3.msra.mxu0 %v90_v3  ;;  %590 = vmatprep.subr.mxu1 %v275_v11  ;;  %v269_v23 = vld [vmem:[#allocation7 + $0x38] sm:$0xff]  ;;  %v79_v24 = vld [vmem:[#allocation5 + $0x8] sm:$0xff]  ;;  %v268_v25 = vld [vmem:[#allocation7 + $0x30] sm:$0xff] }
  0x2e   :  { %538 = vmatprep.subr.mxu0 %v89_v5  ;;  %591 = vmatpush3.msra.mxu1 %v275_v11  ;;  %v78_v26 = vld [vmem:[#allocation5] sm:$0xff]  ;;  %v267_v27 = vld [vmem:[#allocation7 + $0x28] sm:$0xff]  ;;  %v64_v30 = vld [vmem:[#allocation2 + $0x10] sm:$0xff] }
  0x2f   :  { %539 = vmatpush3.msra.mxu0 %v89_v5  ;;  %592 = vmatprep.subr.mxu1 %v274_v13  ;;  %v63_v28 = vld [vmem:[#allocation2 + $0x8] sm:$0xff]  ;;  %v266_v29 = vld [vmem:[#allocation7 + $0x20] sm:$0xff]  ;;  %v65_v31 = vld [vmem:[#allocation2 + $0x18] sm:$0xff] }
  0x30   :  { %540 = vmatprep.subr.mxu0 %v88_v6  ;;  %593 = vmatpush3.msra.mxu1 %v274_v13  ;;  %v66_v32 = vld [vmem:[#allocation2 + $0x20] sm:$0xff]  ;;  %v67_v33 = vld [vmem:[#allocation2 + $0x28] sm:$0xff]  ;;  %v68_v34 = vld [vmem:[#allocation2 + $0x30] sm:$0xff] }
  0x31   :  { %541 = vmatpush3.msra.mxu0 %v88_v6  ;;  %594 = vmatprep.subr.mxu1 %v273_v15  ;;  %v69_v35 = vld [vmem:[#allocation2 + $0x38] sm:$0xff]  ;;  %v70_v36 = vld [vmem:[#allocation2 + $0x40] sm:$0xff]  ;;  %v71_v37 = vld [vmem:[#allocation2 + $0x48] sm:$0xff] }
  0x32   :  { %542 = vmatprep.subr.mxu0 %v87_v7  ;;  %595 = vmatpush3.msra.mxu1 %v273_v15  ;;  %v72_v38 = vld [vmem:[#allocation2 + $0x50] sm:$0xff]  ;;  %v73_v39 = vld [vmem:[#allocation2 + $0x58] sm:$0xff]  ;;  %v74_v40 = vld [vmem:[#allocation2 + $0x60] sm:$0xff] }
  0x33   :  { %543 = vmatpush3.msra.mxu0 %v87_v7  ;;  %596 = vmatprep.subr.mxu1 %v272_v17  ;;  %v75_v41 = vld [vmem:[#allocation2 + $0x68] sm:$0xff]  ;;  %v76_v42 = vld [vmem:[#allocation2 + $0x70] sm:$0xff]  ;;  %v77_v43 = vld [vmem:[#allocation2 + $0x78] sm:$0xff] }
  0x34   :  { %544 = vmatprep.subr.mxu0 %v86_v10  ;;  %597 = vmatpush3.msra.mxu1 %v272_v17  ;;  %v265_v44 = vld [vmem:[#allocation7 + $0x18] sm:$0xff]  ;;  %v264_v45 = vld [vmem:[#allocation7 + $0x10] sm:$0xff]  ;;  %v263_v46 = vld [vmem:[#allocation7 + $0x8] sm:$0xff] }
  0x35   :  { %545 = vmatpush3.msra.mxu0 %v86_v10  ;;  %598 = vmatprep.subr.mxu1 %v271_v19  ;;  %v262_v47 = vld [vmem:[#allocation7] sm:$0xff] }
  0x36   :  { %546 = vmatprep.subr.mxu0 %v85_v12  ;;  %599 = vmatpush3.msra.mxu1 %v271_v19  ;;  %v464_v48 = vld [vmem:[%s802_s2] ss:$0 sm:$0xff] }
  0x37   :  { %547 = vmatpush3.msra.mxu0 %v85_v12  ;;  %600 = vmatprep.subr.mxu1 %v270_v21 }
  0x38   :  { %548 = vmatprep.subr.mxu0 %v84_v14  ;;  %601 = vmatpush3.msra.mxu1 %v270_v21 }
  0x39   :  { %549 = vmatpush3.msra.mxu0 %v84_v14  ;;  %602 = vmatprep.subr.mxu1 %v269_v23 }
  0x3a   :  { %550 = vmatprep.subr.mxu0 %v83_v16  ;;  %603 = vmatpush3.msra.mxu1 %v269_v23 }
  0x3b   :  { %551 = vmatpush3.msra.mxu0 %v83_v16  ;;  %604 = vmatprep.subr.mxu1 %v268_v25 }
  0x3c   :  { %552 = vmatprep.subr.mxu0 %v82_v18  ;;  %605 = vmatpush3.msra.mxu1 %v268_v25 }
  0x3d   :  { %553 = vmatpush3.msra.mxu0 %v82_v18  ;;  %606 = vmatprep.subr.mxu1 %v267_v27 }
  0x3e   :  { %554 = vmatprep.subr.mxu0 %v81_v20  ;;  %607 = vmatpush3.msra.mxu1 %v267_v27 }
  0x3f   :  { %555 = vmatpush3.msra.mxu0 %v81_v20  ;;  %608 = vmatprep.subr.mxu1 %v266_v29 }
  0x40   :  { %556 = vmatprep.subr.mxu0 %v80_v22  ;;  %609 = vmatpush3.msra.mxu1 %v266_v29 }
  0x41   :  { %557 = vmatpush3.msra.mxu0 %v80_v22  ;;  %610 = vmatprep.subr.mxu1 %v265_v44 }
  0x42   :  { %558 = vmatprep.subr.mxu0 %v79_v24  ;;  %611 = vmatpush3.msra.mxu1 %v265_v44 }
  0x43   :  { %559 = vmatpush3.msra.mxu0 %v79_v24  ;;  %612 = vmatprep.subr.mxu1 %v264_v45 }
  0x44   :  { %560 = vmatprep.subr.mxu0 %v78_v26  ;;  %613 = vmatpush3.msra.mxu1 %v264_v45 }
  0x45   :  { %561 = vmatpush3.msra.mxu0 %v78_v26  ;;  %614 = vmatprep.subr.mxu1 %v263_v46 }
  0x46   :  { %563 = vmatmul.mubr.f32.vlgmr.msra.gmra.mxu0 %v63_v28  ;;  %615 = vmatpush3.msra.mxu1 %v263_v46 }
  0x47   :  { %565 = vmatprep.mubr.f32.mxu0 %v64_v30  ;;  %616 = vmatprep.subr.mxu1 %v262_v47 }
  0x48   :  { %617 = vmatpush3.msra.mxu1 %v262_v47 }
  0x4a   :  { %566 = vmatmul.mubr.f32.gmra.mxu0 %v65_v31 }
  0x4b   :  { %568 = vmatprep.mubr.f32.mxu0 %v66_v32 }
  0x4e   :  { %569 = vmatmul.mubr.f32.gmra.mxu0 %v67_v33  ;;  %v465_v33 = vld [vmem:[%s804_s4] ss:$0 sm:$0xff]  ;;  %s739_s4 = smov [#allocation8]  }
  0x4f   :  { %571 = vmatprep.mubr.f32.mxu0 %v68_v34  ;;  %s451_s10 = sshll.u32 %s739_s4, 4  ;;  %s452_s10 = int_to_ptr.vmem [resolvable:$true] %s451_s10 }
  0x50   :  { %s708_s11 = scalar_lea.vmem %s452_s10, 2048  ;;  %p713_p2 = scmp.lt.s32.totalorder %s452_s10, %s452_s10 }
  0x51   :  { %p709_p1 = scmp.ne.s32.totalorder %s452_s10, %s708_s11  ;;  %p714_p3 = scmp.lt.s32.totalorder %s708_s11, %s708_s11 }
  0x52   :  { %572 = vmatmul.mubr.f32.gmra.mxu0 %v69_v35 }
  0x53   :  { %574 = vmatprep.mubr.f32.mxu0 %v70_v36  ;;  %p715_p4 = por %p714_p3, %p713_p2 }
  0x55   :  { %p716_p5 = pnand %p715_p4, %p709_p1 }
  0x56   :  { %575 = vmatmul.mubr.f32.gmra.mxu0 %v71_v37 }
  0x57   :  { %577 = vmatprep.mubr.f32.mxu0 %v72_v38 }
  0x5a   :  { %578 = vmatmul.mubr.f32.gmra.mxu0 %v73_v39 }
  0x5b   :  { %580 = vmatprep.mubr.f32.mxu0 %v74_v40 }
  0x5e   :  { %581 = vmatmul.mubr.f32.gmra.mxu0 %v75_v41 }
  0x5f   :  { %583 = vmatprep.mubr.f32.mxu0 %v76_v42 }
  0x62   :  { %584 = vmatmul.mubr.f32.gmra.mxu0 %v77_v43 }
 0x106   :  { %v564_v49 = vpop.f32.mrf.mxu0 }
 0x107   :  { %v173_v50 = vadd.f32 %v564_v49, %v464_v48 }
 0x108   :  { %v167_v51 = vpop.f32.mrf.mxu0 }
 0x109   :  { %v168_v52 = vadd.f32 %v464_v48, %v167_v51  ;;  %v247_v55 = vmax.f32 %v173_v50, 0.0 }
 0x10a   :  { %v567_v53 = vpop.f32.mrf.mxu0 }
 0x10b   :  { %v246_v54 = vmax.f32 %v168_v52, 0.0  ;;  %v183_v56 = vadd.f32 %v567_v53, %v464_v48 }
 0x10c   :  { %v177_v57 = vpop.f32.mrf.mxu0 }
 0x10d   :  { %v178_v58 = vadd.f32 %v464_v48, %v177_v57  ;;  %618 = vmatprep.mubr.f32.mxu1 %v246_v54  ;;  %v249_v61 = vmax.f32 %v183_v56, 0.0 }
 0x10e   :  { %v570_v59 = vpop.f32.mrf.mxu0  ;;  %619 = vmatmul.mubr.f32.vlgmr.msra.gmra.mxu1 %v247_v55 }
 0x10f   :  { %v248_v60 = vmax.f32 %v178_v58, 0.0  ;;  %v193_v62 = vadd.f32 %v570_v59, %v464_v48 }
 0x110   :  { %v187_v63 = vpop.f32.mrf.mxu0 }
 0x111   :  { %v188_v0 = vadd.f32 %v464_v48, %v187_v63  ;;  %621 = vmatprep.mubr.f32.mxu1 %v248_v60  ;;  %v251_v3 = vmax.f32 %v193_v62, 0.0 }
 0x112   :  { %v573_v1 = vpop.f32.mrf.mxu0  ;;  %622 = vmatmul.mubr.f32.gmra.mxu1 %v249_v61 }
 0x113   :  { %v250_v2 = vmax.f32 %v188_v0, 0.0  ;;  %v203_v4 = vadd.f32 %v573_v1, %v464_v48 }
 0x114   :  { %v197_v5 = vpop.f32.mrf.mxu0 }
 0x115   :  { %v198_v6 = vadd.f32 %v464_v48, %v197_v5  ;;  %624 = vmatprep.mubr.f32.mxu1 %v250_v2  ;;  %v253_v9 = vmax.f32 %v203_v4, 0.0 }
 0x116   :  { %v576_v7 = vpop.f32.mrf.mxu0  ;;  %625 = vmatmul.mubr.f32.gmra.mxu1 %v251_v3 }
 0x117   :  { %v252_v8 = vmax.f32 %v198_v6, 0.0  ;;  %v213_v10 = vadd.f32 %v576_v7, %v464_v48 }
 0x118   :  { %v207_v11 = vpop.f32.mrf.mxu0 }
 0x119   :  { %v208_v12 = vadd.f32 %v464_v48, %v207_v11  ;;  %627 = vmatprep.mubr.f32.mxu1 %v252_v8  ;;  %v255_v15 = vmax.f32 %v213_v10, 0.0 }
 0x11a   :  { %v579_v13 = vpop.f32.mrf.mxu0  ;;  %628 = vmatmul.mubr.f32.gmra.mxu1 %v253_v9 }
 0x11b   :  { %v254_v14 = vmax.f32 %v208_v12, 0.0  ;;  %v223_v16 = vadd.f32 %v579_v13, %v464_v48 }
 0x11c   :  { %v217_v17 = vpop.f32.mrf.mxu0 }
 0x11d   :  { %v218_v18 = vadd.f32 %v464_v48, %v217_v17  ;;  %630 = vmatprep.mubr.f32.mxu1 %v254_v14  ;;  %v257_v21 = vmax.f32 %v223_v16, 0.0 }
 0x11e   :  { %v582_v19 = vpop.f32.mrf.mxu0  ;;  %631 = vmatmul.mubr.f32.gmra.mxu1 %v255_v15 }
 0x11f   :  { %v256_v20 = vmax.f32 %v218_v18, 0.0  ;;  %v233_v22 = vadd.f32 %v582_v19, %v464_v48 }
 0x120   :  { %v227_v23 = vpop.f32.mrf.mxu0 }
 0x121   :  { %v228_v24 = vadd.f32 %v464_v48, %v227_v23  ;;  %633 = vmatprep.mubr.f32.mxu1 %v256_v20  ;;  %v259_v27 = vmax.f32 %v233_v22, 0.0 }
 0x122   :  { %v585_v25 = vpop.f32.mrf.mxu0  ;;  %634 = vmatmul.mubr.f32.gmra.mxu1 %v257_v21 }
 0x123   :  { %v258_v26 = vmax.f32 %v228_v24, 0.0  ;;  %v243_v28 = vadd.f32 %v585_v25, %v464_v48 }
 0x124   :  { %v237_v29 = vpop.f32.mrf.mxu0 }
 0x125   :  { %v238_v30 = vadd.f32 %v464_v48, %v237_v29  ;;  %636 = vmatprep.mubr.f32.mxu1 %v258_v26  ;;  %v261_v32 = vmax.f32 %v243_v28, 0.0 }
 0x126   :  { %637 = vmatmul.mubr.f32.gmra.mxu1 %v259_v27 }
 0x127   :  { %v260_v31 = vmax.f32 %v238_v30, 0.0 }
 0x129   :  { %639 = vmatprep.mubr.f32.mxu1 %v260_v31 }
 0x12a   :  { %640 = vmatmul.mubr.f32.gmra.mxu1 %v261_v32 }
 0x1ce   :  { %v620_v34 = vpop.f32.mrf.mxu1 }
 0x1cf   :  { %v357_v35 = vadd.f32 %v620_v34, %v465_v33 }
 0x1d0   :  { %v351_v36 = vpop.f32.mrf.mxu1 }
 0x1d1   :  { %431 = vst [vmem:[#allocation8 + $0x8] sm:$0xff] %v357_v35  ;;  %v352_v37 = vadd.f32 %v465_v33, %v351_v36 }
 0x1d2   :  { %v623_v38 = vpop.f32.mrf.mxu1 }
 0x1d3   :  { %430 = vst [vmem:[#allocation8] sm:$0xff] %v352_v37  ;;  %v367_v39 = vadd.f32 %v623_v38, %v465_v33 }
 0x1d4   :  { %v361_v40 = vpop.f32.mrf.mxu1 }
 0x1d5   :  { %433 = vst [vmem:[#allocation8 + $0x18] sm:$0xff] %v367_v39  ;;  %v362_v41 = vadd.f32 %v465_v33, %v361_v40 }
 0x1d6   :  { %v626_v42 = vpop.f32.mrf.mxu1 }
 0x1d7   :  { %432 = vst [vmem:[#allocation8 + $0x10] sm:$0xff] %v362_v41  ;;  %v377_v43 = vadd.f32 %v626_v42, %v465_v33 }
 0x1d8   :  { %v371_v44 = vpop.f32.mrf.mxu1 }
 0x1d9   :  { %435 = vst [vmem:[#allocation8 + $0x28] sm:$0xff] %v377_v43  ;;  %v372_v45 = vadd.f32 %v465_v33, %v371_v44 }
 0x1da   :  { %v629_v46 = vpop.f32.mrf.mxu1 }
 0x1db   :  { %434 = vst [vmem:[#allocation8 + $0x20] sm:$0xff] %v372_v45  ;;  %v387_v47 = vadd.f32 %v629_v46, %v465_v33 }
 0x1dc   :  { %v381_v48 = vpop.f32.mrf.mxu1 }
 0x1dd   :  { %437 = vst [vmem:[#allocation8 + $0x38] sm:$0xff] %v387_v47  ;;  %v382_v49 = vadd.f32 %v465_v33, %v381_v48 }
 0x1de   :  { %v632_v50 = vpop.f32.mrf.mxu1 }
 0x1df   :  { %436 = vst [vmem:[#allocation8 + $0x30] sm:$0xff] %v382_v49  ;;  %v397_v51 = vadd.f32 %v632_v50, %v465_v33 }
 0x1e0   :  { %v391_v52 = vpop.f32.mrf.mxu1 }
 0x1e1   :  { %439 = vst [vmem:[#allocation8 + $0x48] sm:$0xff] %v397_v51  ;;  %v392_v53 = vadd.f32 %v465_v33, %v391_v52 }
 0x1e2   :  { %v635_v54 = vpop.f32.mrf.mxu1 }
 0x1e3   :  { %438 = vst [vmem:[#allocation8 + $0x40] sm:$0xff] %v392_v53  ;;  %v407_v55 = vadd.f32 %v635_v54, %v465_v33 }
 0x1e4   :  { %v401_v56 = vpop.f32.mrf.mxu1 }
 0x1e5   :  { %441 = vst [vmem:[#allocation8 + $0x58] sm:$0xff] %v407_v55  ;;  %v402_v57 = vadd.f32 %v465_v33, %v401_v56 }
 0x1e6   :  { %v638_v58 = vpop.f32.mrf.mxu1 }
 0x1e7   :  { %440 = vst [vmem:[#allocation8 + $0x50] sm:$0xff] %v402_v57  ;;  %v417_v59 = vadd.f32 %v638_v58, %v465_v33 }
 0x1e8   :  { %v411_v60 = vpop.f32.mrf.mxu1 }
 0x1e9   :  { %443 = vst [vmem:[#allocation8 + $0x68] sm:$0xff] %v417_v59  ;;  %v412_v61 = vadd.f32 %v465_v33, %v411_v60 }
 0x1ea   :  { %v641_v62 = vpop.f32.mrf.mxu1 }
 0x1eb   :  { %442 = vst [vmem:[#allocation8 + $0x60] sm:$0xff] %v412_v61  ;;  %v427_v63 = vadd.f32 %v641_v62, %v465_v33 }
 0x1ec   :  { %v421_v0 = vpop.f32.mrf.mxu1 }
 0x1ed   :  { %445 = vst [vmem:[#allocation8 + $0x78] sm:$0xff] %v427_v63  ;;  %v422_v1 = vadd.f32 %v465_v33, %v421_v0 }
 0x1ef   :  { %444 = vst [vmem:[#allocation8 + $0x70] sm:$0xff] %v422_v1 }
 0x1f0   :  { %719 = shalt.err (!%p716_p5)
}
 0x1f1   :  { %457 = dma.vmem_to_hbm [thread:$0]  %s452_s10, 2048, %s805_s5, [#allocation4], %s736_s23, %s736_s23, %s737_s24  }
 0x1f2   :  { %732 = dma.done.wait [#allocation4], 2048  }
 0x1f3   :  { %733 = vsyncadd [#allocation4], 4294965248 }
 0x1f4   :  { %461 = vsyncpa [#allocation3], 1 }
 0x1f5   :  { %462 = vsyncpa [#allocation6], 1 }
 0x1f6   :  { %463 = vsyncpa [#allocation4], 1 }

</bundles_post_ra>
